<compile_context>
chip_gen: v7x
topology: tpu7x:2x2x1
jax: 0.10.0
libtpu: 0.0.40
codegen_flags: <defaults>
</compile_context>

<pallas_src>
import functools

import jax
import jax.numpy as jnp
from jax.experimental import pallas as pl
from jax.experimental.pallas import tpu as pltpu


def _lora_embedding_kernel(ids_ref, wa_hbm_ref, bt_ref, out_ref,
                           gather_buf, sems, *,
                           tokens_per_block, d_model, num_sems):
    """One grid step: gather T rows of [W | A_T], emit a dense (T, D) block.

    ids_ref:     (N_pad,) int32 in SMEM (scalar prefetch).
    wa_hbm_ref:  (V, D + r) concatenated [W | lora_A.T] table, left in HBM.
    bt_ref:      (r, D) scaling * lora_B.T, VMEM-resident across the grid.
    out_ref:     (T, D) output block.
    gather_buf:  (T, D + r) VMEM scratch for the gathered rows.
    sems:        (num_sems,) DMA semaphores -> num_sems row copies in flight.
    """
    T = tokens_per_block
    D = d_model
    base_tok = pl.program_id(0) * T

    # Row-gather pipeline: keep `num_sems` HBM row DMAs in flight at once.
    @pl.loop(0, T)
    def _(t):
        # Before reusing semaphore slot (t % num_sems), retire the copy that
        # last used it (copy t - num_sems).
        @pl.when(t >= num_sems)
        def _():
            pltpu.make_async_copy(wa_hbm_ref.at[0],
                                  gather_buf.at[t - num_sems],
                                  sems.at[t % num_sems]).wait()
        row = ids_ref[base_tok + t]
        pltpu.make_async_copy(wa_hbm_ref.at[row],
                              gather_buf.at[t],
                              sems.at[t % num_sems]).start()

    # Drain the tail copies.
    @pl.loop(max(T - num_sems, 0), T)
    def _(t):
        pltpu.make_async_copy(wa_hbm_ref.at[0],
                              gather_buf.at[t],
                              sems.at[t % num_sems]).wait()

    base = gather_buf[:, :D].astype(jnp.float32)         # (T, D) gathered W rows
    a_rows = gather_buf[:, D:]                           # (T, r) gathered A_T rows
    lora = jnp.dot(a_rows, bt_ref[...],
                   preferred_element_type=jnp.float32)   # (T, D) on the MXU
    out_ref[...] = (base + lora).astype(out_ref.dtype)


def lora_embedding_forward(input_ids, base_weight, lora_A, lora_B, scaling,
                           *, tokens_per_block=16, num_inflight_copies=8):
    """input_ids: (B, S) int -> (B, S, D) in base_weight.dtype."""
    B, S = input_ids.shape
    V, D = base_weight.shape
    r = lora_A.shape[0]
    N = B * S
    T = tokens_per_block
    num_sems = min(num_inflight_copies, T)

    # Clamp ids so a bad token id cannot trigger an out-of-bounds HBM DMA
    # (the PyTorch module would raise on such input; this is defensive only).
    ids_flat = jnp.clip(input_ids.reshape(N).astype(jnp.int32), 0, V - 1)

    # Pad the token axis to a whole number of blocks (extra rows discarded).
    n_blocks = (N + T - 1) // T
    n_pad = n_blocks * T
    if n_pad != N:
        ids_flat = jnp.pad(ids_flat, (0, n_pad - N))

    # Wrapper-side layout plumbing, done once per call (no in-kernel .T):
    #   WA  = [W | lora_A.T]      -> one row DMA fetches the W row AND the A row.
    #   B_T = scaling * lora_B.T  -> scaling folded in, O(r*D) once.
    wa = jnp.concatenate(
        [base_weight, lora_A.T.astype(base_weight.dtype)], axis=1)   # (V, D+r)
    b_t = (lora_B.T * scaling).astype(base_weight.dtype)             # (r, D)

    kernel = functools.partial(
        _lora_embedding_kernel,
        tokens_per_block=T, d_model=D, num_sems=num_sems)

    grid_spec = pltpu.PrefetchScalarGridSpec(
        num_scalar_prefetch=1,          # ids -> SMEM, read by the kernel body
        grid=(n_blocks,),               # one block of T tokens per step
        in_specs=[
            pl.BlockSpec(memory_space=pl.ANY),                  # WA stays in HBM
            pl.BlockSpec((r, D), lambda i, ids: (0, 0)),        # B_T, VMEM-resident
        ],
        out_specs=pl.BlockSpec((T, D), lambda i, ids: (i, 0)),  # dense (T, D) block
        scratch_shapes=[
            pltpu.VMEM((T, D + r), base_weight.dtype),          # gathered rows
            pltpu.SemaphoreType.DMA((num_sems,)),               # copies in flight
        ],
    )

    out = pl.pallas_call(
        kernel,
        out_shape=jax.ShapeDtypeStruct((n_pad, D), base_weight.dtype),
        grid_spec=grid_spec,
        compiler_params=pltpu.CompilerParams(
            dimension_semantics=("parallel",)),   # v7x: shard blocks over 2 TCs
    )(ids_flat, wa, b_t)

    return out[:N].reshape(B, S, D)


def _reference(input_ids, base_weight, lora_A, lora_B, scaling):
    base = base_weight[input_ids]                 # (B, S, D)
    lora_w = (lora_B @ lora_A).T                  # (V, D)
    return base + lora_w[input_ids] * scaling


if __name__ == "__main__":
    # Module hyperparameters (small, consistent with nn.Embedding + LoRA rank).
    num_embeddings = 64    # V
    embedding_dim = 128    # D (multiple of 128 -> lane-dense output stores)
    rank = 16
    alpha = 32.0
    scaling = alpha / rank

    batch, seq = 2, 32     # N = 64 tokens -> 4 blocks of T = 16

    key = jax.random.PRNGKey(0)
    k_w, k_a, k_b, k_ids = jax.random.split(key, 4)

    # nn.Embedding default init: normal(0, 1).
    base_weight = jax.random.normal(k_w, (num_embeddings, embedding_dim),
                                    jnp.float32)
    # The module zero-inits lora_A; use small random values so the LoRA path is
    # exercised non-trivially (shapes match the module exactly).
    lora_A = 0.02 * jax.random.normal(k_a, (rank, num_embeddings), jnp.float32)
    lora_B = jax.random.normal(k_b, (embedding_dim, rank), jnp.float32)

    input_ids = jax.random.randint(k_ids, (batch, seq), 0, num_embeddings,
                                   jnp.int32)

    out = lora_embedding_forward(input_ids, base_weight, lora_A, lora_B, scaling,
                                 tokens_per_block=16, num_inflight_copies=8)
    out = jax.block_until_ready(out)

    ref = _reference(input_ids, base_weight, lora_A, lora_B, scaling)
    assert out.shape == (batch, seq, embedding_dim)
    assert jnp.allclose(out, ref, atol=1e-4, rtol=1e-4), "mismatch vs reference"

    print("KERNEL_OK")
</pallas_src>

<mosaic_0001>
module attributes {stable_mosaic.version = 11 : i64} {
  func.func @_lora_embedding_kernel(%arg0: i32, %arg1: memref<64xi32, #tpu.memory_space<smem>>, %arg2: memref<64x144xf32, #tpu.memory_space<any>>, %arg3: memref<16x128xf32, #tpu.memory_space<vmem>>, %arg4: memref<16x128xf32, #tpu.memory_space<vmem>>, %arg5: memref<16x144xf32, #tpu.memory_space<vmem>>, %arg6: memref<8x!tpu.dma_semaphore, #tpu.memory_space<semaphore_mem>>) attributes {dimension_semantics = [#tpu.dimension_semantics<parallel>], iteration_bounds = array<i64: 4>, scalar_prefetch = 1 : i64, scratch_operands = 2 : i64, tpu.core_type = #tpu.core_type<tc>, window_params = [{}, {pipeline_mode = #tpu.pipeline_mode<synchronous>, transform_indices = @transform_1, window_bounds = array<i64: 16, 128>}, {transform_indices = @transform_2, window_bounds = array<i64: 16, 128>}]} {
    %c16_i32 = arith.constant 16 : i32
    %0 = arith.muli %arg0, %c16_i32 : i32
    %c0_i32 = arith.constant 0 : i32
    %c16_i32_0 = arith.constant 16 : i32
    %1 = arith.addi %c0_i32, %c16_i32_0 : i32
    %c1_i32 = arith.constant 1 : i32
    scf.for %arg7 = %c0_i32 to %1 step %c1_i32  : i32 {
      %c1_i32_11 = arith.constant 1 : i32
      %9 = arith.muli %arg7, %c1_i32_11 : i32
      %c0_i32_12 = arith.constant 0 : i32
      %10 = arith.addi %c0_i32_12, %9 : i32
      %c8_i32_13 = arith.constant 8 : i32
      %11 = arith.cmpi sge, %10, %c8_i32_13 : i32
      %12 = arith.extui %11 : i1 to i32
      %c0_i32_14 = arith.constant 0 : i32
      %13 = arith.cmpi ne, %12, %c0_i32_14 : i32
      scf.if %13 {
        %c8_i32_23 = arith.constant 8 : i32
        %33 = arith.subi %10, %c8_i32_23 : i32
        %c8_i32_24 = arith.constant 8 : i32
        %c0_i32_25 = arith.constant 0 : i32
        %34 = arith.cmpi eq, %c8_i32_24, %c0_i32_25 : i32
        %c1_i32_26 = arith.constant 1 : i32
        %35 = arith.select %34, %c1_i32_26, %c8_i32_24 : i32
        %36 = arith.remsi %10, %35 : i32
        %c0_i32_27 = arith.constant 0 : i32
        %37 = arith.cmpi ne, %36, %c0_i32_27 : i32
        %c0_i32_28 = arith.constant 0 : i32
        %38 = arith.cmpi slt, %36, %c0_i32_28 : i32
        %c0_i32_29 = arith.constant 0 : i32
        %39 = arith.cmpi slt, %35, %c0_i32_29 : i32
        %40 = arith.xori %38, %39 : i1
        %41 = arith.andi %40, %37 : i1
        %42 = arith.addi %36, %35 : i32
        %43 = arith.select %41, %42, %36 : i32
        %c0_i32_30 = arith.constant 0 : i32
        %c0_i32_31 = arith.constant 0 : i32
        %44 = tpu.memref_slice %arg2[%c0_i32_30, %c0_i32_31] : memref<64x144xf32, #tpu.memory_space<any>> -> memref<1x144xf32, #tpu.memory_space<any>>
        %45 = tpu.memref_squeeze %44 : memref<1x144xf32, #tpu.memory_space<any>> -> memref<144xf32, #tpu.memory_space<any>>
        %c0_i32_32 = arith.constant 0 : i32
        %46 = tpu.memref_slice %arg5[%33, %c0_i32_32] : memref<16x144xf32, #tpu.memory_space<vmem>> -> memref<1x144xf32, #tpu.memory_space<vmem>>
        %47 = tpu.memref_squeeze %46 : memref<1x144xf32, #tpu.memory_space<vmem>> -> memref<144xf32, #tpu.memory_space<vmem>>
        %48 = tpu.memref_slice %arg6[%43] : memref<8x!tpu.dma_semaphore, #tpu.memory_space<semaphore_mem>> -> memref<1x!tpu.dma_semaphore, #tpu.memory_space<semaphore_mem>>
        %49 = tpu.memref_squeeze %48 : memref<1x!tpu.dma_semaphore, #tpu.memory_space<semaphore_mem>> -> memref<!tpu.dma_semaphore, #tpu.memory_space<semaphore_mem>>
        tpu.wait_dma2 semaphore(%49 : memref<!tpu.dma_semaphore, #tpu.memory_space<semaphore_mem>>) src(%45 : memref<144xf32, #tpu.memory_space<any>>) dst(%47 : memref<144xf32, #tpu.memory_space<vmem>>)
      } else {
      }
      %14 = arith.addi %0, %10 : i32
      %15 = arith.index_cast %14 : i32 to index
      %16 = memref.load %arg1[%15] : memref<64xi32, #tpu.memory_space<smem>>
      %c8_i32_15 = arith.constant 8 : i32
      %c0_i32_16 = arith.constant 0 : i32
      %17 = arith.cmpi eq, %c8_i32_15, %c0_i32_16 : i32
      %c1_i32_17 = arith.constant 1 : i32
      %18 = arith.select %17, %c1_i32_17, %c8_i32_15 : i32
      %19 = arith.remsi %10, %18 : i32
      %c0_i32_18 = arith.constant 0 : i32
      %20 = arith.cmpi ne, %19, %c0_i32_18 : i32
      %c0_i32_19 = arith.constant 0 : i32
      %21 = arith.cmpi slt, %19, %c0_i32_19 : i32
      %c0_i32_20 = arith.constant 0 : i32
      %22 = arith.cmpi slt, %18, %c0_i32_20 : i32
      %23 = arith.xori %21, %22 : i1
      %24 = arith.andi %23, %20 : i1
      %25 = arith.addi %19, %18 : i32
      %26 = arith.select %24, %25, %19 : i32
      %c0_i32_21 = arith.constant 0 : i32
      %27 = tpu.memref_slice %arg2[%16, %c0_i32_21] : memref<64x144xf32, #tpu.memory_space<any>> -> memref<1x144xf32, #tpu.memory_space<any>>
      %28 = tpu.memref_squeeze %27 : memref<1x144xf32, #tpu.memory_space<any>> -> memref<144xf32, #tpu.memory_space<any>>
      %c0_i32_22 = arith.constant 0 : i32
      %29 = tpu.memref_slice %arg5[%10, %c0_i32_22] : memref<16x144xf32, #tpu.memory_space<vmem>> -> memref<1x144xf32, #tpu.memory_space<vmem>>
      %30 = tpu.memref_squeeze %29 : memref<1x144xf32, #tpu.memory_space<vmem>> -> memref<144xf32, #tpu.memory_space<vmem>>
      %31 = tpu.memref_slice %arg6[%26] : memref<8x!tpu.dma_semaphore, #tpu.memory_space<semaphore_mem>> -> memref<1x!tpu.dma_semaphore, #tpu.memory_space<semaphore_mem>>
      %32 = tpu.memref_squeeze %31 : memref<1x!tpu.dma_semaphore, #tpu.memory_space<semaphore_mem>> -> memref<!tpu.dma_semaphore, #tpu.memory_space<semaphore_mem>>
      tpu.enqueue_dma source(%28 : memref<144xf32, #tpu.memory_space<any>>) target(%30 : memref<144xf32, #tpu.memory_space<vmem>>) target_semaphore(%32 : memref<!tpu.dma_semaphore, #tpu.memory_space<semaphore_mem>>)
    }
    %c16_i32_1 = arith.constant 16 : i32
    %c0_i32_2 = arith.constant 0 : i32
    %c8_i32 = arith.constant 8 : i32
    %2 = arith.addi %c0_i32_2, %c8_i32 : i32
    %c1_i32_3 = arith.constant 1 : i32
    scf.for %arg7 = %c0_i32_2 to %2 step %c1_i32_3  : i32 {
      %c1_i32_11 = arith.constant 1 : i32
      %9 = arith.muli %arg7, %c1_i32_11 : i32
      %c8_i32_12 = arith.constant 8 : i32
      %10 = arith.addi %c8_i32_12, %9 : i32
      %c8_i32_13 = arith.constant 8 : i32
      %c0_i32_14 = arith.constant 0 : i32
      %11 = arith.cmpi eq, %c8_i32_13, %c0_i32_14 : i32
      %c1_i32_15 = arith.constant 1 : i32
      %12 = arith.select %11, %c1_i32_15, %c8_i32_13 : i32
      %13 = arith.remsi %10, %12 : i32
      %c0_i32_16 = arith.constant 0 : i32
      %14 = arith.cmpi ne, %13, %c0_i32_16 : i32
      %c0_i32_17 = arith.constant 0 : i32
      %15 = arith.cmpi slt, %13, %c0_i32_17 : i32
      %c0_i32_18 = arith.constant 0 : i32
      %16 = arith.cmpi slt, %12, %c0_i32_18 : i32
      %17 = arith.xori %15, %16 : i1
      %18 = arith.andi %17, %14 : i1
      %19 = arith.addi %13, %12 : i32
      %20 = arith.select %18, %19, %13 : i32
      %c0_i32_19 = arith.constant 0 : i32
      %c0_i32_20 = arith.constant 0 : i32
      %21 = tpu.memref_slice %arg2[%c0_i32_19, %c0_i32_20] : memref<64x144xf32, #tpu.memory_space<any>> -> memref<1x144xf32, #tpu.memory_space<any>>
      %22 = tpu.memref_squeeze %21 : memref<1x144xf32, #tpu.memory_space<any>> -> memref<144xf32, #tpu.memory_space<any>>
      %c0_i32_21 = arith.constant 0 : i32
      %23 = tpu.memref_slice %arg5[%10, %c0_i32_21] : memref<16x144xf32, #tpu.memory_space<vmem>> -> memref<1x144xf32, #tpu.memory_space<vmem>>
      %24 = tpu.memref_squeeze %23 : memref<1x144xf32, #tpu.memory_space<vmem>> -> memref<144xf32, #tpu.memory_space<vmem>>
      %25 = tpu.memref_slice %arg6[%20] : memref<8x!tpu.dma_semaphore, #tpu.memory_space<semaphore_mem>> -> memref<1x!tpu.dma_semaphore, #tpu.memory_space<semaphore_mem>>
      %26 = tpu.memref_squeeze %25 : memref<1x!tpu.dma_semaphore, #tpu.memory_space<semaphore_mem>> -> memref<!tpu.dma_semaphore, #tpu.memory_space<semaphore_mem>>
      tpu.wait_dma2 semaphore(%26 : memref<!tpu.dma_semaphore, #tpu.memory_space<semaphore_mem>>) src(%22 : memref<144xf32, #tpu.memory_space<any>>) dst(%24 : memref<144xf32, #tpu.memory_space<vmem>>)
    }
    %c8_i32_4 = arith.constant 8 : i32
    %c0 = arith.constant 0 : index
    %c0_5 = arith.constant 0 : index
    %3 = vector.load %arg5[%c0, %c0_5] : memref<16x144xf32, #tpu.memory_space<vmem>>, vector<16x128xf32>
    %c0_6 = arith.constant 0 : index
    %c128 = arith.constant 128 : index
    %4 = vector.load %arg5[%c0_6, %c128] : memref<16x144xf32, #tpu.memory_space<vmem>>, vector<16x16xf32>
    %c0_7 = arith.constant 0 : index
    %c0_8 = arith.constant 0 : index
    %5 = vector.load %arg3[%c0_7, %c0_8] : memref<16x128xf32, #tpu.memory_space<vmem>>, vector<16x128xf32>
    %cst = arith.constant dense<0.000000e+00> : vector<16x128xf32>
    %6 = tpu.matmul %4, %5, %cst {dimension_numbers = #tpu.dot_dimension_numbers<[1], [0], [0], [1], [0, 0, 1, 1], [], []>} : vector<16x16xf32>, vector<16x128xf32>, vector<16x128xf32> -> vector<16x128xf32>
    %7 = arith.addf %3, %6 : vector<16x128xf32>
    %c0_9 = arith.constant 0 : index
    %c0_10 = arith.constant 0 : index
    %8 = vector.load %arg4[%c0_9, %c0_10] : memref<16x128xf32, #tpu.memory_space<vmem>>, vector<16x128xf32>
    tpu.vector_store %arg4[%c0_9, %c0_10], %7 {strides = array<i32>} : memref<16x128xf32, #tpu.memory_space<vmem>>, vector<16x128xf32>,
    return
  }
  func.func @transform_1(%arg0: i32, %arg1: memref<64xi32, #tpu.memory_space<smem>>) -> (i32, i32) {
    %c0_i32 = arith.constant 0 : i32
    %c0_i32_0 = arith.constant 0 : i32
    %c0_i32_1 = arith.constant 0 : i32
    return %c0_i32, %c0_i32_0 : i32, i32
  }
  func.func @transform_2(%arg0: i32, %arg1: memref<64xi32, #tpu.memory_space<smem>>) -> (i32, i32) {
    %c0_i32 = arith.constant 0 : i32
    %c0_i32_0 = arith.constant 0 : i32
    return %arg0, %c0_i32 : i32, i32
  }
}

</mosaic_0001>

<bundles_post_ra>
// kernel: tpu_custom_call.1
= control target key start
LH: loop header
LB: loop body
LE: loop exit
PB: predicated region body
PF: predicated region fallthrough
CT: control target
= control target key end

     0   :  { %s942_s0 = inlined_call_operand.hbm [shape: s32[64], index: 0, kind: input, shape index: {}]   ;;  %s943_s1 = inlined_call_operand.hbm [shape: f32[64,144], index: 1, kind: input, shape index: {}]   ;;  %s944_s2 = inlined_call_operand.hbm [shape: f32[16,128], index: 2, kind: input, shape index: {}]   ;;  %s945_s3 = inlined_call_operand.hbm [shape: f32[64,128], index: 3, kind: output, shape index: {}]  }
   0x1   :  { %950 = sst [smem:[#allocation17_spill]] %s944_s2  ;;  %s566_s14 = scalar_lea.hbm %s942_s0, 16 }
   0x2   :  { %p567_p0 = scmp.ne.s32.totalorder %s942_s0, %s566_s14  ;;  %p570_p1 = scmp.lt.u32.totalorder %s566_s14, %s942_s0 }
   0x4   :  { %p572_p2 = pnand %p570_p1, %p567_p0 }
   0x6   :  { %575 = shalt.err (!%p572_p2)  }
   0x7   :  { %s720_s19 = smov [#allocation5]  }
   0x8   :  { %9 = dma.hbm_to_smem %s942_s0, 16, %s720_s19, [#allocation4] }
   0x9   :  { %680 = dma.done.wait [#allocation4], 16 }
   0xa   :  { %681 = vsyncadd [#allocation4], 4294967280 }
   0xb   :  { %11 = sfence }
   0xc   :  { %12 = vsyncpa [#allocation7], 0 }
   0xd   :  { %13 = vsyncpa [#allocation8], 0 }
   0xe   :  { %15 = vsyncpa [#allocation8 + $0x1], 0  ;;  %s762_s22 = smov 0   ;;  %s764_s23 = smov 0  }
   0xf   :  { %s766_s24 = smov 0   ;;  %s768_s25 = smov 0  }
  0x10 LB: > { %s783_s0 = sadd.s32 4294967295, %s710_s25   ;;  %s439_s26 = sadd.s32 4294967294, %s710_s25   ;;  %s710_s25 = sphi %s768_s25, %s968_s25   ;;  %s706_s24 = sphi %s766_s24, %s967_s24   ;;  %s702_s23 = sphi %s764_s23, %s966_s23   ;;  %s698_s22 = sphi %s762_s22, %s965_s22  }
  0x11   : > { %s787_s27 = sadd.s32 1, %s710_s25   ;;  %s49_s28 = sadd.s32 1, %s706_s24 }
  0x12   : > { %s46_s29 = ssub.s32 %s710_s25, %s787_s27  ;;  %p59_p3 = scmp.ne.s32.totalorder %s706_s24, %s702_s23 }
  0x13   : > { %p47_p4 = scmp.eq.s32.totalorder %s46_s29, 0  ;;  %p60_p5 = scmp.eq.s32.totalorder %s783_s0, 3 }
  0x14   : > { %p65_p6 = scmp.ne.s32.totalorder %s702_s23, %s698_s22  ;;  %p66_p7 = scmp.eq.s32.totalorder %s439_s26, 3 }
  0x15   : > { %s798_s30 = scalar_select %p47_p4, %s706_s24, %s49_s28  }
  0x16   : > { %p800_p8 = por %p60_p5, %p59_p3  ;;  %p804_p9 = por %p66_p7, %p65_p6 }
  0x17   : > { %951 = sst [smem:[#allocation16_spill]] %s798_s30  ;;  %p440_p10 = scmp.ge.s32.totalorder %s710_s25, 1 }
  0x18   : > { %s952_s4 = scalar_select %p800_p8, 1, 0 }
  0x19   : > { %s953_s5 = scalar_select %p804_p9, 1, 0 }
  0x1a   : > { %p73_p11 = scmp.lt.s32.totalorder %s710_s25, 5  ;;  %p946_p12 = scmp.eq.s32.totalorder %s783_s0, 0 }
  0x1b   : > { %s721_s7 = smov [#allocation6]   ;;  %s956_s2 = sld [smem:[#allocation17_spill]] }
  0x1c   : > { %p811_p13 = pnand %p440_p10, %p73_p11  ;;  %s85_s8 = sshll.u32 %s721_s7, 4  ;;  %s86_s8 = int_to_ptr.vmem [resolvable:$true] %s85_s8 }
  0x1e   : > { %s954_s6 = scalar_select %p811_p13, 1, 0 }
  0x1f   : > { %p498_p0 = pneg %p811_p13 }
  0x21   : > { %p819_p1 = pnand %p946_p12, %p498_p0  ;;  %s576_s12 = scalar_lea.hbm %s956_s2, 256 }
  0x22   : > { %p577_p2 = scmp.ne.s32.totalorder %s956_s2, %s576_s12  ;;  %p583_p6 = scmp.lt.u32.totalorder %s576_s12, %s956_s2 }
  0x23   : > { %p578_p3 = pneg %p819_p1 }
  0x25   : > { %p579_p4 = pnand %p578_p3, %p577_p2 }
  0x27   : > { %p580_p5 = pneg %p579_p4 }
  0x29   : > { %p585_p7 = pnand %p583_p6, %p580_p5 }
  0x2b   : > { %588 = shalt.err (!%p585_p7)
}
  0x2c   : > { %s589_s17 = scalar_lea.vmem %s86_s8, 256  ;;  %p597_p12 = scmp.lt.s32.totalorder %s86_s8, %s86_s8 }
  0x2d   : > { %p590_p10 = scmp.ne.s32.totalorder %s86_s8, %s589_s17  ;;  %p598_p9 = scmp.lt.s32.totalorder %s589_s17, %s589_s17 }
  0x2f   : > { %p592_p11 = pnand %p590_p10, %p578_p3  ;;  %p599_p8 = por %p598_p9, %p597_p12 }
  0x31   : > { %p593_p0 = pneg %p592_p11 }
  0x33   : > { %p600_p13 = pnand %p599_p8, %p593_p0 }
  0x35   : > { %603 = shalt.err (!%p600_p13)
}
  0x36   : > { %s722_s18 = smov 128   ;;  %s723_s19 = smov 8  }
  0x37   : > { %501 = dma.hbm_to_vmem [thread:$0]  (!%p819_p1), %s956_s2, 256, %s86_s8, [#allocation7], %s722_s18, %s722_s18, %s723_s19  }
  0x38   : > { %p957_p2 = scmp.ne.s32.totalorder %s954_s6, 0 }
  0x39   : > { %p958_p4 = scmp.eq.s32.totalorder (!%p957_p2), %s783_s0, 0 }
  0x3a   : > { %101 = sbr.rel (%p957_p2) target bundleno = 375 (0x177), region = 24 }
  0x41   : > { %683 = dma.done.wait (%p958_p4), [#allocation7], 256   ;;  %p959_p3 = pmov %p958_p4 }
  0x42   : > { %s949_s26 = sand.u32 1, %s702_s23   ;;  %s851_s9 = smov 0  }
  0x43   : > { %685 = vsyncadd (%p959_p3), [#allocation7], 4294967040  ;;  %s444_s29 = sshll.u32 %s949_s26, 4 }
  0x44   : > { %s849_s7 = scalar_lea.vmem [#allocation9], %s444_s29 }
  0x45 LB: >> { %p508_p8 = scmp.ge.s32.totalorder %s714_s9, 8  ;;  %p128_p9 = scmp.lt.s32.totalorder %s714_s9, 0  ;;  %s714_s9 = sphi %s851_s9, %s123_s9  }
  0x46   : >> { %s129_s6 = ssub.s32 0, %s714_s9 }
  0x47   : >> { %s447_s8 = smin.u32 %s714_s9, %s129_s6 }
  0x48   : >> { %s131_s10 = sand.u32 7, %s447_s8  }
  0x49   : >> { %s132_s11 = ssub.s32 0, %s131_s10 }
  0x4a   : >> { %s970_s11 = smov (!%p128_p9, %s132_s11), %s131_s10 }
  0x4b   : >> { %p449_p12 = scmp.lt.s32.totalorder %s970_s11, 0  ;;  %s138_s12 = sadd.s32 8, %s970_s11 }
  0x4d   : >> { %s972_s12 = smov (!%p449_p12, %s138_s12), %s970_s11 }
  0x4e   : >> { %s860_s13 = scalar_lea.sflag [#allocation3], %s972_s12 }
  0x4f   : >> { %687 = dma.done.wait (%p508_p8), %s860_s13, 32 }
  0x50   : >> { %689 = vsyncadd (%p508_p8), %s860_s13, 4294967264  ;;  %s960_s28 = sshll.u32 %s783_s0, 4  ;;  %s163_s15 = sshrl.u32 %s714_s9, 3 }
  0x51   : >> { %s143_s14 = sadd.s32 %s714_s9, %s960_s28  ;;  %s164_s17 = sand.u32 7, %s714_s9  }
  0x52   : >> { %s144_s16 = sld [smem:[#allocation5 + %s143_s14]]  ;;  %s455_s18 = sshll.u32 %s163_s15, 4 }
  0x53   : >> { %s166_s19 = sadd.s32 %s455_s18, %s164_s17  ;;  %s606_s15 = scalar_lea.hbm %s943_s1, 2048 }
  0x54   : >> { %s167_s20 = scalar_lea.vmem [#allocation2], %s166_s19 }
  0x55   : >> { %s170_s21 = sshll.u32 %s167_s20, 4  ;;  %s869_s21 = int_to_ptr.vmem [resolvable:$true] %s170_s21 }
  0x58   : >> { %s157_s29 = sshrl.u32 %s144_s16, 3  ;;  %s158_s6 = sand.u32 7, %s144_s16  }
  0x59   : >> { %s453_s8 = sshll.u32 %s157_s29, 4 }
  0x5a   : >> { %s160_s10 = sadd.s32 %s453_s8, %s158_s6 }
  0x5b   : >> { %s454_s11 = sshll.u32 %s160_s10, 4 }
  0x5c   : >> { %s162_s2 = scalar_lea.hbm %s943_s1, %s454_s11 }
  0x5d   : >> { %s604_s30 = scalar_lea.hbm %s162_s2, 32  ;;  %p607_p1 = scmp.lt.u32.totalorder %s162_s2, %s943_s1 }
  0x5e   : >> { %p605_p13 = scmp.ne.s32.totalorder %s162_s2, %s604_s30  ;;  %p608_p5 = scmp.lt.u32.totalorder %s606_s15, %s604_s30 }
  0x5f   : >> { %p610_p7 = scmp.lt.u32.totalorder %s604_s30, %s162_s2 }
  0x60   : >> { %p609_p6 = por %p608_p5, %p607_p1 }
  0x62   : >> { %p611_p10 = por %p610_p7, %p609_p6 }
  0x64   : >> { %p612_p11 = pnand %p611_p10, %p605_p13 }
  0x66   : >> { %615 = shalt.err (!%p612_p11)  }
  0x67   : >> { %s616_s26 = scalar_lea.vmem %s869_s21, 32  ;;  %s724_s16 = smov [#allocation2]  }
  0x68   : >> { %p617_p0 = scmp.ne.s32.totalorder %s869_s21, %s616_s26  ;;  %s618_s19 = sshll.u32 %s724_s16, 4  ;;  %s619_s19 = int_to_ptr.vmem [resolvable:$false] %s618_s19 }
  0x69   : >> { %s620_s28 = scalar_lea.vmem %s619_s19, 512  ;;  %p621_p2 = scmp.lt.s32.totalorder %s869_s21, %s619_s19 }
  0x6a   : >> { %p622_p4 = scmp.lt.s32.totalorder %s620_s28, %s616_s26 }
  0x6c   : >> { %p623_p3 = por %p622_p4, %p621_p2 }
  0x6e   : >> { %p624_p8 = pnand %p623_p3, %p617_p0 }
  0x70   : >> { %627 = shalt.err (!%p624_p8)  }
  0x71   : >> { %s725_s20 = smov 128   ;;  %s726_s30 = smov 1  }
  0x72   : >> { %173 = dma.hbm_to_vmem [thread:$0]  %s162_s2, 32, %s869_s21, %s860_s13, %s725_s20, %s725_s20, %s726_s30 }
  0x73   : >> { %s123_s9 = sadd.s32 1, %s714_s9  }
  0x74   : >> { %p120_p9 = scmp.ge.s32.totalorder %s123_s9, 16  }
  0x75   : > { %s716_s29 = smov (%p120_p9), 0  }
  0x76   : > { %122 = sbr.rel (!%p120_p9) target bundleno = 69 (0x45), region = 91 }
  0x7d LB: >> { %s180_s6 = sadd.s32 8, %s718_s29  ;;  %s718_s29 = sphi %s716_s29, %s179_s29  }
  0x7e   : >> { %p181_p12 = scmp.lt.s32.totalorder %s180_s6, 0  ;;  %s182_s8 = ssub.s32 0, %s180_s6 }
  0x7f   : >> { %s456_s10 = smin.u32 %s182_s8, %s180_s6 }
  0x80   : >> { %s184_s11 = sand.u32 7, %s456_s10  }
  0x81   : >> { %s185_s12 = ssub.s32 0, %s184_s11 }
  0x82   : >> { %s974_s12 = smov (!%p181_p12, %s185_s12), %s184_s11 }
  0x83   : >> { %p458_p13 = scmp.lt.s32.totalorder %s974_s12, 0  ;;  %s191_s14 = sadd.s32 8, %s974_s12 }
  0x85   : >> { %s976_s14 = smov (!%p458_p13, %s191_s14), %s974_s12 }
  0x86   : >> { %s193_s2 = scalar_lea.sflag [#allocation3], %s976_s14 }
  0x87   : >> { %690 = dma.done.wait %s193_s2, 32 }
  0x88   : >> { %691 = vsyncadd %s193_s2, 4294967264  ;;  %s179_s29 = sadd.s32 1, %s718_s29  }
  0x89   : >> { %p176_p1 = scmp.ge.s32.totalorder %s179_s29, 8  }
  0x8a   : > { %v200_v0 = vld [vmem:[#allocation6] sm:$0xff] (%p176_p1)  ;;  %v201_v1 = vld [vmem:[#allocation6 + $0x8] sm:$0xff] (%p176_p1)  ;;  %vm202_vm0 = vcmask (%p176_p1), 130048   ;;  %v199_v4 = vld [vmem:[#allocation2 + $0x18] sm:$0xff] (%p176_p1)  ;;  %s474_s9 = sshll.u32 (%p176_p1), %s783_s0, 8  ;;  %s302_s13 = sshll.u32 (%p176_p1), %s849_s7, 4  ;;  %s895_s13 = int_to_ptr.vmem [resolvable:$true] %s302_s13 }
  0x8b   : > { %178 = sbr.rel (!%p176_p1) target bundleno = 125 (0x7d), region = 102  ;;  %v198_v2 = vld [vmem:[#allocation2 + $0x8] sm:$0xff] (%p176_p1)  ;;  %v486_v3 = vpack.c.bf16 (%p176_p1), %v201_v1, %v200_v0  ;;  %v197_v5 = vld [vmem:[#allocation2 + $0x10] sm:$0xff] (%p176_p1)  ;;  %v196_v6 = vld [vmem:[#allocation2] sm:$0xff] (%p176_p1)  ;;  %s893_s17 = scalar_lea.hbm (%p176_p1), %s945_s3, %s474_s9 }
  0x8c   : > { %483 = vmatprep.mubr.msk.f32.mxu0 (%p176_p1), %vm202_vm0, %v198_v2  ;;  %s961_s18 = sand.u32 (%p176_p1), 1, %s702_s23   ;;  %s628_s26 = scalar_lea.vmem (%p176_p1), %s895_s13, 256 }
  0x8d   : > { %487 = vmatprep.subr.bf16.mxu0 (%p176_p1), %v486_v3  ;;  %s901_s0 = scalar_lea.sflag (%p176_p1), [#allocation8], %s961_s18  ;;  %p629_p5 = scmp.ne.s32.totalorder (%p176_p1), %s895_s13, %s628_s26 }
  0x8e   : > { %489 = vmatpush3.bf16.msra.mxu0 (%p176_p1), %v486_v3  ;;  %p962_p6 = scmp.ne.s32.totalorder (%p176_p1), %s952_s4, 0  ;;  %s727_s16 = smov (%p176_p1), [#allocation9]  }
  0x8f   : > { %s632_s19 = sshll.u32 (%p176_p1), %s727_s16, 4  ;;  %s633_s19 = int_to_ptr.vmem [resolvable:$false] %s632_s19 }
  0x90   : > { %p630_p7 = pnand (%p176_p1), %p629_p5, %p962_p6  ;;  %s634_s28 = scalar_lea.vmem (%p176_p1), %s633_s19, 512 }
  0x91   : > { %484 = vmatmul.mubr.msk.f32.vlgmr.msra.gmra.mrb[0].mxu0 (%p176_p1), %vm202_vm0, %v199_v4  ;;  %p635_p11 = scmp.lt.s32.totalorder (%p176_p1), %s895_s13, %s633_s19  ;;  %p636_p0 = scmp.lt.s32.totalorder (%p176_p1), %s634_s28, %s628_s26 }
  0x92   : > { %p631_p10 = pneg %p630_p7 }
  0x93   : > { %p637_p2 = por %p636_p0, %p635_p11 }
  0x95   : > { %p638_p4 = pnand %p637_p2, %p631_p10 }
 0x164   : > { %v485_v7 = vpop.f32.mrb[0].mxu0 }
 0x165   : > { %v285_v8 = vadd.f32 %v485_v7, %v197_v5  ;;  %v275_v9 = vpop.f32.mrb[1].mxu0 }
 0x166   : > { %v284_v10 = vadd.f32 %v275_v9, %v196_v6 }
 0x167   : > { %287 = vst [vmem:[%s849_s7 + $0x8] sm:$0xff] %v285_v8 }
 0x168   : > { %286 = vst [vmem:[%s849_s7] sm:$0xff] %v284_v10 }
 0x169   : > { %641 = shalt.err (!%p638_p4)
}
 0x16a   : > { %s642_s7 = scalar_lea.hbm %s893_s17, 256  ;;  %s646_s29 = scalar_lea.hbm %s945_s3, 1024 }
 0x16b   : > { %p643_p3 = scmp.ne.s32.totalorder %s893_s17, %s642_s7  ;;  %p647_p12 = scmp.lt.u32.totalorder %s893_s17, %s945_s3 }
 0x16c   : > { %p648_p13 = scmp.lt.u32.totalorder %s646_s29, %s642_s7  ;;  %p650_p5 = scmp.lt.u32.totalorder %s642_s7, %s893_s17 }
 0x16d   : > { %p644_p8 = pnand %p643_p3, %p962_p6 }
 0x16e   : > { %p649_p1 = por %p648_p13, %p647_p12 }
 0x16f   : > { %p645_p9 = pneg %p644_p8 }
 0x170   : > { %p651_p7 = por %p650_p5, %p649_p1 }
 0x172   : > { %p652_p10 = pnand %p651_p7, %p645_p9 }
 0x174   : > { %655 = shalt.err (!%p652_p10)
}
 0x175   : > { %s728_s10 = smov 128   ;;  %s729_s11 = smov 8  }
 0x176   : > { %496 = dma.vmem_to_hbm [thread:$0]  (%p962_p6), %s895_s13, 256, %s893_s17, %s901_s0, %s728_s10, %s728_s10, %s729_s11  }
 0x177 PF: > { %p509_p11 = scmp.ge.s32.totalorder %s710_s25, 2  ;;  %s317_s12 = sand.u32 1, %s698_s22  }
 0x178   : > { %p963_p0 = scmp.ne.s32.totalorder %s953_s5, 0  ;;  %s318_s14 = scalar_lea.sflag [#allocation8], %s317_s12 }
 0x17a   : > { %p503_p2 = pnand %p509_p11, %p963_p0 }
 0x17c   : > { %693 = dma.done.wait (!%p503_p2), %s318_s14, 256  }
 0x17d   : > { %695 = vsyncadd (!%p503_p2), %s318_s14, 4294967040  ;;  %s964_s2 = sld [smem:[#allocation16_spill]]  ;;  %p18_p4 = scmp.ge.s32.totalorder %s787_s27, 6  }
 0x17e   : > { %s965_s22 = smov %s702_s23  ;;  %s966_s23 = smov %s706_s24 }
 0x17f   : > { %s968_s25 = smov %s787_s27  ;;  %20 = sbr.rel (!%p18_p4) target bundleno = 16 (0x10), region = 113 }
 0x183   : > { %s967_s24 = smov %s964_s2 }
 0x186   :  { %323 = vsyncpa [#allocation7], 1 }
 0x187   :  { %325 = vsyncpa [#allocation7 + $0x1], 1 }
 0x188   :  { %326 = vsyncpa [#allocation8], 1 }
 0x189   :  { %328 = vsyncpa [#allocation8 + $0x1], 1 }
 0x18a   :  { %329 = vsyncmov [#allocation3] }
 0x18d   :  { %s330_s25 = vpop.sfrf %329 }
 0x18e   :  { %p466_p6 = scmp.ne.s32.totalorder %s330_s25, 0 }
 0x190   :  { %334 = shalt.err (%p466_p6)  }
 0x191   :  { %336 = vsyncmov [#allocation3 + $0x1] }
 0x194   :  { %s337_s4 = vpop.sfrf %336 }
 0x195   :  { %p467_p3 = scmp.ne.s32.totalorder %s337_s4, 0 }
 0x197   :  { %341 = shalt.err (%p467_p3)  }
 0x198   :  { %343 = vsyncmov [#allocation3 + $0x2] }
 0x19b   :  { %s344_s5 = vpop.sfrf %343 }
 0x19c   :  { %p468_p8 = scmp.ne.s32.totalorder %s344_s5, 0 }
 0x19e   :  { %348 = shalt.err (%p468_p8)  }
 0x19f   :  { %350 = vsyncmov [#allocation3 + $0x3] }
 0x1a2   :  { %s351_s9 = vpop.sfrf %350 }
 0x1a3   :  { %p469_p9 = scmp.ne.s32.totalorder %s351_s9, 0 }
 0x1a5   :  { %355 = shalt.err (%p469_p9)  }
 0x1a6   :  { %357 = vsyncmov [#allocation3 + $0x4] }
 0x1a9   :  { %s358_s1 = vpop.sfrf %357 }
 0x1aa   :  { %p470_p12 = scmp.ne.s32.totalorder %s358_s1, 0 }
 0x1ac   :  { %362 = shalt.err (%p470_p12)  }
 0x1ad   :  { %364 = vsyncmov [#allocation3 + $0x5] }
 0x1b0   :  { %s365_s3 = vpop.sfrf %364 }
 0x1b1   :  { %p471_p13 = scmp.ne.s32.totalorder %s365_s3, 0 }
 0x1b3   :  { %369 = shalt.err (%p471_p13)  }
 0x1b4   :  { %371 = vsyncmov [#allocation3 + $0x6] }
 0x1b7   :  { %s372_s22 = vpop.sfrf %371 }
 0x1b8   :  { %p472_p1 = scmp.ne.s32.totalorder %s372_s22, 0 }
 0x1ba   :  { %376 = shalt.err (%p472_p1)  }
 0x1bb   :  { %378 = vsyncmov [#allocation3 + $0x7] }
 0x1be   :  { %s379_s23 = vpop.sfrf %378 }
 0x1bf   :  { %p473_p5 = scmp.ne.s32.totalorder %s379_s23, 0 }
 0x1c1   :  { %383 = shalt.err (%p473_p5)  }

</bundles_post_ra>
